<compile_context>
chip_gen: v5e
topology: v5e:2x2
jax: 0.10.0
libtpu: 0.0.40
codegen_flags: <defaults>
</compile_context>

<pallas_src>
import functools

import numpy as np
import jax
import jax.numpy as jnp
from jax import lax
from jax.experimental import pallas as pl
from jax.experimental.pallas import tpu as pltpu

EPS = 1e-5


# --------------------------------------------------------------------------
# Parameter preprocessing: fold eval-mode BN into the conv weights.
# --------------------------------------------------------------------------
def _bn_fold(gamma, beta, mean, var):
    scale = gamma / jnp.sqrt(var + EPS)
    bias = beta - mean * scale
    return scale.astype(jnp.float32), bias.astype(jnp.float32)


def _fold_params(p):
    """Fold BN into conv weights, channel-major layout.

    Pointwise / skip 1x1 : (Cout, Cin) bf16  (MXU operands, scale folded in).
    Depthwise 3x3 taps   : (9, C, 1) f32     (VPU path, broadcast over lanes).
    Biases               : (C, 1) f32.
    """
    def pw(w_io, bn):                             # w_io: (Cin, Cout)
        s, b = _bn_fold(*bn)
        w_oi = (w_io * s[None, :]).T              # (Cout, Cin)
        return w_oi.astype(jnp.bfloat16), b.reshape(-1, 1)

    def dw(w, bn):                                # w: (3, 3, C)
        s, b = _bn_fold(*bn)
        return ((w * s[None, None, :]).reshape(9, -1, 1).astype(jnp.float32),
                b.reshape(-1, 1))

    out = {}
    if "skip_w" in p:
        out["skip_w"], out["skip_b"] = pw(p["skip_w"], p["skip_bn"])
    out["dw1"], out["b1a"] = dw(p["dw1"], p["bn1a"])
    out["pw1"], out["b1b"] = pw(p["pw1"], p["bn1b"])
    out["dw2"], out["b2a"] = dw(p["dw2"], p["bn2a"])
    out["pw2"], out["b2b"] = pw(p["pw2"], p["bn2b"])
    out["dw3"], out["b3a"] = dw(p["dw3"], p["bn3a"])
    out["pw3"], out["b3b"] = pw(p["pw3"], p["bn3b"])
    return out


# --------------------------------------------------------------------------
# Depthwise-tap geometry: lane-roll amounts + border-validity masks.
# --------------------------------------------------------------------------
@functools.cache
def _roll_moves_forward():
    """Resolve the pltpu.roll direction convention with a 1-vreg probe.

    Returns True iff pltpu.roll matches np.roll (element i -> index i+shift).
    """
    def probe(x_ref, o_ref):
        o_ref[...] = pltpu.roll(x_ref[...], 1, 1)

    x = jnp.tile(jnp.arange(128, dtype=jnp.float32)[None, :], (8, 1))
    y = pl.pallas_call(
        probe, out_shape=jax.ShapeDtypeStruct((8, 128), jnp.float32))(x)
    return bool(y[0, 0] == 127.0)                 # np.roll: last elem wraps to 0


def _make_masks(H, W, d):
    """(9, 1, H*W) f32 validity masks for the 3x3 taps at dilation d."""
    ii, jj = np.meshgrid(np.arange(H), np.arange(W), indexing="ij")
    m = np.zeros((9, 1, H * W), np.float32)
    for k in range(9):
        dki, dkj = k // 3 - 1, k % 3 - 1
        valid = ((ii + dki * d >= 0) & (ii + dki * d < H) &
                 (jj + dkj * d >= 0) & (jj + dkj * d < W))
        m[k, 0] = valid.reshape(-1).astype(np.float32)
    return jnp.asarray(m)


def _tap_shifts(H, W, d, forward):
    """Static lane-roll amounts so that rolled[p] == x[p + off_k]."""
    HW = H * W
    shifts = []
    for k in range(9):
        off = (k // 3 - 1) * d * W + (k % 3 - 1) * d
        shifts.append(((-off) % HW) if forward else (off % HW))
    return tuple(shifts)


# --------------------------------------------------------------------------
# Fused Block kernel: one grid step per batch element, everything in VMEM,
# activations kept as (C, H*W) slabs with H*W on the lane axis.
# --------------------------------------------------------------------------
def _block_kernel(x_ref,
                  skip_w_ref, skip_b_ref,
                  m1_ref, m2_ref, m3_ref,
                  dw1_ref, b1a_ref, pw1_ref, b1b_ref,
                  dw2_ref, b2a_ref, pw2_ref, b2b_ref,
                  dw3_ref, b3a_ref, pw3_ref, b3b_ref,
                  o_ref,
                  *, shifts, has_skip):

    def depthwise_bn_relu(h, dw_r, b_r, m_r, sh):
        # h: (C, HW) f32; dw_r: (9, C, 1); b_r: (C, 1); m_r: (9, 1, HW).
        acc = h * dw_r[4]                              # centre tap: no shift/mask
        for k in range(9):
            if k == 4:
                continue
            rolled = pltpu.roll(h, sh[k], 1)           # XLU lane rotation
            acc = acc + (rolled * m_r[k]) * dw_r[k]    # border mask + per-chan tap
        return jnp.maximum(acc + b_r[...], 0.0)

    def pointwise_bn(h, w_r, b_r, relu):
        # (Cin, HW) -> (Cout, HW): 1x1 conv on MXU, bf16 operands, f32 accumulate.
        y = jnp.dot(w_r[...], h.astype(jnp.bfloat16),
                    preferred_element_type=jnp.float32)
        y = y + b_r[...]
        return jnp.maximum(y, 0.0) if relu else y

    x2d = x_ref[0].astype(jnp.float32)                 # (Cin, HW)

    if has_skip:
        skip = pointwise_bn(x2d, skip_w_ref, skip_b_ref, relu=False)
    else:
        skip = x2d                                     # identity skip

    h = depthwise_bn_relu(x2d, dw1_ref, b1a_ref, m1_ref, shifts[0])
    h = pointwise_bn(h, pw1_ref, b1b_ref, relu=True)
    h = depthwise_bn_relu(h, dw2_ref, b2a_ref, m2_ref, shifts[1])
    h = pointwise_bn(h, pw2_ref, b2b_ref, relu=True)
    h = depthwise_bn_relu(h, dw3_ref, b3a_ref, m3_ref, shifts[2])
    h = pointwise_bn(h, pw3_ref, b3b_ref, relu=True)

    # Residual add; single lane-dense (Cout, HW) store (== flattened NCHW).
    o_ref[0] = (h + skip).astype(o_ref.dtype)


def block_forward(x_nchw, params, atrous=(1, 1, 1)):
    """PyTorch-layout entry point: x (N, Cin, H, W) -> (N, Cout, H, W)."""
    if isinstance(atrous, int):
        atrous = (atrous,) * 3
    N, Cin, H, W = x_nchw.shape
    HW = H * W
    fp = _fold_params(params)
    has_skip = "skip_w" in fp
    Cout = fp["pw3"].shape[0]
    if not has_skip:
        assert Cin == Cout, "identity skip requires in_filters == out_filters"

    x2d = x_nchw.reshape(N, Cin, HW)                   # free view of NCHW

    if has_skip:
        skip_w, skip_b = fp["skip_w"], fp["skip_b"]
    else:                                              # unused dummies
        skip_w = jnp.zeros((1, 1), jnp.bfloat16)
        skip_b = jnp.zeros((1, 1), jnp.float32)

    forward = _roll_moves_forward()
    masks = [_make_masks(H, W, d) for d in atrous]
    shifts = tuple(_tap_shifts(H, W, d, forward) for d in atrous)

    def full(a):
        nd = a.ndim
        return pl.BlockSpec(a.shape, lambda n: (0,) * nd)

    weights = [skip_w, skip_b, masks[0], masks[1], masks[2],
               fp["dw1"], fp["b1a"], fp["pw1"], fp["b1b"],
               fp["dw2"], fp["b2a"], fp["pw2"], fp["b2b"],
               fp["dw3"], fp["b3a"], fp["pw3"], fp["b3b"]]

    kern = functools.partial(_block_kernel, shifts=shifts, has_skip=has_skip)

    out = pl.pallas_call(
        kern,
        out_shape=jax.ShapeDtypeStruct((N, Cout, HW), x_nchw.dtype),
        grid_spec=pltpu.PrefetchScalarGridSpec(
            num_scalar_prefetch=0,
            grid=(N,),
            in_specs=[pl.BlockSpec((1, Cin, HW), lambda n: (n, 0, 0))]
                     + [full(w) for w in weights],
            out_specs=pl.BlockSpec((1, Cout, HW), lambda n: (n, 0, 0)),
        ),
        compiler_params=pltpu.CompilerParams(
            dimension_semantics=("parallel",)),
    )(x2d, *weights)

    return out.reshape(N, Cout, H, W)                  # free view, already NCHW


# --------------------------------------------------------------------------
# Pure-JAX reference with the same dtype policy (bf16-rounded matmul operands,
# f32 accumulation, eval-mode folded BN) for the correctness check.
# --------------------------------------------------------------------------
def block_reference(x_nchw, params, atrous=(1, 1, 1)):
    if isinstance(atrous, int):
        atrous = (atrous,) * 3
    fp = _fold_params(params)
    x = jnp.transpose(x_nchw, (0, 2, 3, 1)).astype(jnp.float32)   # NHWC

    def dw(h, w9, b, d):
        C = h.shape[-1]
        y = lax.conv_general_dilated(
            h, w9.reshape(3, 3, 1, C).astype(jnp.float32),
            window_strides=(1, 1), padding=((d, d), (d, d)),
            rhs_dilation=(d, d),
            dimension_numbers=("NHWC", "HWIO", "NHWC"),
            feature_group_count=C,
            precision=lax.Precision.HIGHEST)
        return jnp.maximum(y + b[:, 0], 0.0)

    def pw(h, w_oi, b, relu=True):
        y = jnp.einsum("nhwc,dc->nhwd",
                       h.astype(jnp.bfloat16).astype(jnp.float32),
                       w_oi.astype(jnp.float32),
                       precision=lax.Precision.HIGHEST)
        y = y + b[:, 0]
        return jnp.maximum(y, 0.0) if relu else y

    if "skip_w" in fp:
        skip = pw(x, fp["skip_w"], fp["skip_b"], relu=False)
    else:
        skip = x
    h = dw(x, fp["dw1"], fp["b1a"], atrous[0])
    h = pw(h, fp["pw1"], fp["b1b"])
    h = dw(h, fp["dw2"], fp["b2a"], atrous[1])
    h = pw(h, fp["pw2"], fp["b2b"])
    h = dw(h, fp["dw3"], fp["b3a"], atrous[2])
    h = pw(h, fp["pw3"], fp["b3b"])
    return jnp.transpose(h + skip, (0, 3, 1, 2))


# --------------------------------------------------------------------------
def _make_params(key, in_f, out_f, grow_first=True):
    counter = [0]

    def nk():
        counter[0] += 1
        return jax.random.fold_in(key, counter[0])

    def bn(c):
        return (1.0 + 0.1 * jax.random.normal(nk(), (c,), jnp.float32),      # gamma
                0.1 * jax.random.normal(nk(), (c,), jnp.float32),            # beta
                0.1 * jax.random.normal(nk(), (c,), jnp.float32),            # running_mean
                0.5 + jnp.abs(jax.random.normal(nk(), (c,), jnp.float32)))   # running_var

    def w(shape, fan_in):
        return jax.random.normal(nk(), shape, jnp.float32) / jnp.sqrt(fan_in)

    filters = out_f if grow_first else in_f
    p = {
        "dw1": w((3, 3, in_f), 9.0), "bn1a": bn(in_f),
        "pw1": w((in_f, filters), in_f), "bn1b": bn(filters),
        "dw2": w((3, 3, filters), 9.0), "bn2a": bn(filters),
        "pw2": w((filters, out_f), filters), "bn2b": bn(out_f),
        "dw3": w((3, 3, out_f), 9.0), "bn3a": bn(out_f),
        "pw3": w((out_f, out_f), out_f), "bn3b": bn(out_f),
    }
    if out_f != in_f:                       # strides==1 here: conv+BN skip branch
        p["skip_w"] = w((in_f, out_f), in_f)
        p["skip_bn"] = bn(out_f)
    return p


if __name__ == "__main__":
    key = jax.random.PRNGKey(0)
    H, W = 16, 16

    # Case 1: conv+BN skip (out_filters != in_filters), dilation 1.
    k_x, k_p = jax.random.split(jax.random.fold_in(key, 1))
    N, in_f, out_f = 2, 8, 16
    x = jax.random.normal(k_x, (N, in_f, H, W), jnp.float32)
    params = _make_params(k_p, in_f, out_f)
    out = jax.block_until_ready(block_forward(x, params, atrous=(1, 1, 1)))
    assert out.shape == (N, out_f, H, W), out.shape
    ref = block_reference(x, params, atrous=(1, 1, 1))
    err = float(jnp.max(jnp.abs(out - ref)))
    assert jnp.allclose(out, ref, atol=5e-2, rtol=5e-2), err

    # Case 2: identity skip (out_filters == in_filters), atrous dilation 2.
    k_x, k_p = jax.random.split(jax.random.fold_in(key, 2))
    N, in_f, out_f = 2, 16, 16
    x = jax.random.normal(k_x, (N, in_f, H, W), jnp.float32)
    params = _make_params(k_p, in_f, out_f)
    out = jax.block_until_ready(block_forward(x, params, atrous=(2, 2, 2)))
    assert out.shape == (N, out_f, H, W), out.shape
    ref = block_reference(x, params, atrous=(2, 2, 2))
    err = float(jnp.max(jnp.abs(out - ref)))
    assert jnp.allclose(out, ref, atol=5e-2, rtol=5e-2), err

    print("KERNEL_OK")
</pallas_src>

<mosaic_0001>
module attributes {stable_mosaic.version = 11 : i64} {
  func.func @probe(%arg0: memref<8x128xf32, #tpu.memory_space<vmem>>, %arg1: memref<8x128xf32, #tpu.memory_space<vmem>>) attributes {dimension_semantics = [], scalar_prefetch = 0 : i64, scratch_operands = 0 : i64, tpu.core_type = #tpu.core_type<tc>} {
    %c0 = arith.constant 0 : index
    %c0_0 = arith.constant 0 : index
    %0 = vector.load %arg0[%c0, %c0_0] : memref<8x128xf32, #tpu.memory_space<vmem>>, vector<8x128xf32>
    %c1_i32 = arith.constant 1 : i32
    %1 = tpu.dynamic_rotate %0 by %c1_i32 dim 1 : vector<8x128xf32>, i32 -> vector<8x128xf32>
    %c0_1 = arith.constant 0 : index
    %c0_2 = arith.constant 0 : index
    %2 = vector.load %arg1[%c0_1, %c0_2] : memref<8x128xf32, #tpu.memory_space<vmem>>, vector<8x128xf32>
    tpu.vector_store %arg1[%c0_1, %c0_2], %1 {strides = array<i32>} : memref<8x128xf32, #tpu.memory_space<vmem>>, vector<8x128xf32>,
    return
  }
}

</mosaic_0001>

<bundles_post_ra>
// kernel: tpu_custom_call.1
= control target key start
LH: loop header
LB: loop body
LE: loop exit
PB: predicated region body
PF: predicated region fallthrough
CT: control target
= control target key end

     0   :  { %6 = vsyncpa [#allocation3], 0  ;;  %s118_s0 = inlined_call_operand.hbm [shape: f32[8,128], index: 0, kind: input, shape index: {}]   ;;  %s119_s1 = inlined_call_operand.hbm [shape: f32[8,128], index: 1, kind: output, shape index: {}]  }
   0x1   :  { %7 = vsyncpa [#allocation4], 0  ;;  %s13_s8 = sshll.u32 %s118_s0, 4  ;;  %s99_s9 = smov [#allocation2]   ;;  %s14_s8 = int_to_ptr.hbm [resolvable:$true] %s13_s8 }
   0x2   :  { %s15_s10 = sshll.u32 %s99_s9, 4  ;;  %s16_s10 = int_to_ptr.vmem [resolvable:$true] %s15_s10 }
   0x3   :  { %18 = dma.hbm_to_vmem [thread:$0]  %s14_s8, 128, %s16_s10, [#allocation3]  }
   0x4   :  { %95 = dma.done.wait [#allocation3], 128  }
   0x5   :  { %96 = vsyncadd [#allocation3], 4294967168  ;;  %v23_v0 = vld [vmem:[#allocation2] sm:$0xff]  ;;  %s100_s11 = smov 1   ;;  %s101_s12 = smov [#allocation5]  }
   0x6   :  { %24 = vrot.lane.b32.xlu0 %v23_v0, %s100_s11  ;;  %s32_s13 = sshll.u32 %s101_s12, 4  ;;  %s34_s16 = sshll.u32 %s119_s1, 4  ;;  %s33_s13 = int_to_ptr.vmem [resolvable:$true] %s32_s13  ;;  %s35_s16 = int_to_ptr.hbm [resolvable:$true] %s34_s16 }
  0x78   :  { %v25_v1 = vpop.permute.xlu0 %24 }
  0x79   :  { %26 = vst [vmem:[#allocation5] sm:$0xff] %v25_v1 }
  0x7a   :  { %37 = dma.vmem_to_hbm [thread:$0]  %s33_s13, 128, %s35_s16, [#allocation4]  }
  0x7b   :  { %97 = dma.done.wait [#allocation4], 128  }
  0x7c   :  { %98 = vsyncadd [#allocation4], 4294967168 }
  0x7d   :  { %42 = vsyncpa [#allocation3], 1 }
  0x7e   :  { %43 = vsyncpa [#allocation4], 1 }

</bundles_post_ra>
